<compile_context>
chip_gen: v5e
topology: v5e:2x2
jax: 0.10.0
libtpu: 0.0.40
codegen_flags: <defaults>
</compile_context>

<pallas_src>
import functools

import jax
import jax.numpy as jnp
from jax import lax
from jax.experimental import pallas as pl
from jax.experimental.pallas import tpu as pltpu


def _vmem_capacity_bytes():
    """Per-core VMEM capacity; conservative 64 MiB (v7x) fallback if unknown."""
    try:
        info = pltpu.get_tpu_info()
        for name in ("vmem_capacity_bytes", "vmem_size_bytes", "vmem_bytes"):
            cap = getattr(info, name, None)
            if cap:
                return int(cap)
    except Exception:
        pass
    return 64 * 1024 * 1024


def _choose_tiling(N, H, W, Cin, Cout, itemsize, vmem_cap):
    """Pick (images-per-block Bn, rows-per-strip Hs).

    Constraints: Hs divides H and the strip is lane-aligned ((Hs*W) % 128 == 0)
    or covers the whole image; per-step VMEM (double-buffered blocks + f32
    temporaries) stays under a generation-aware budget (~capacity/5).
    Preferences: fill sublanes (Bn*Cin >= 8 f32 / 16 bf16), then >= 2 grid
    steps (v7x 2-TC sharding / pipeline depth), then the biggest block.
    """
    row_cands = [d for d in range(1, H + 1)
                 if H % d == 0 and (d == H or (d * W) % 128 == 0)]
    bn_cands = [b for b in range(1, N + 1)
                if N % b == 0 and (b == 1 or (b * Cin <= 32 and b * Cout <= 64))]
    spv = 8 * max(1, 4 // itemsize)                    # sublanes per vreg
    budget = max(4 << 20, vmem_cap // 5)

    def step_bytes(bn, hs):
        ls = hs * W
        io = 2 * bn * (Cin + Cout) * ls * itemsize     # double-buffered in/out
        tmp = (4 * Cin + 8 * Cout) * bn * ls * 4       # f32 temporaries / partials
        halo = 4 * bn * Cin * max(W, 128) * itemsize
        wgt = 2 * 9 * (bn * Cout) * (bn * Cin) * itemsize
        return io + tmp + halo + wgt

    cands = [(b, d) for b in bn_cands for d in row_cands
             if step_bytes(b, d) <= budget]
    if not cands:
        cands = [(1, min(row_cands))]
    filled = [c for c in cands if c[0] * Cin >= spv]
    if filled:
        cands = filled
    multi = [c for c in cands if (N // c[0]) * (H // c[1]) >= 2]
    if multi:
        cands = multi
    return max(cands, key=lambda c: (c[0] * c[1], c[1]))


def _dwsep_kernel(*refs, W, has_halo):
    # has_halo: (x, top, bot, wk, beff, o, acc);  else: (x, wk, beff, o, acc)
    if has_halo:
        x_ref, top_ref, bot_ref, wk_ref, beff_ref, o_ref, acc_ref = refs
    else:
        x_ref, wk_ref, beff_ref, o_ref, acc_ref = refs
        top_ref = bot_ref = None

    CoutF, Ls = o_ref.shape[1], o_ref.shape[2]
    f32 = jnp.float32
    # MXU operand dtype: bf16 I/O stays bf16 (full-rate MXU on v6e/v7x);
    # everything else runs f32 (v5e-safe).  Accumulation is always f32.
    cd = jnp.bfloat16 if x_ref.dtype == jnp.bfloat16 else f32

    def lroll(v, shift):                       # static lane rotate (XLU slot)
        s = shift % v.shape[-1]
        return pltpu.roll(v, s, axis=v.ndim - 1) if s else v

    x = x_ref[0].astype(cd)                    # (CinF, Ls)
    beff = beff_ref[...].astype(f32)           # (CoutF, 1)

    lane = lax.broadcasted_iota(jnp.int32, (1, Ls), 1)
    col = lane % W

    # Row-shifted bases (dh = -1, 0, +1): pure lane rolls + one row mask each.
    # The wrapped row is zeroed (== zero-padding at the strip boundary); real
    # inter-strip halo rows are added back as aligned fix-ups below.
    x_up = jnp.where(lane >= W, lroll(x, W), 0.0).astype(cd)
    x_dn = jnp.where(lane < Ls - W, lroll(x, -W), 0.0).astype(cd)
    bases = (x_up, x, x_dn)

    # Fused depthwise+pointwise: 3 row-offsets x 3 col-offsets = 9 accumulating
    # (CoutF, CinF) x (CinF, Ls) MXU matmuls.  The +-1 column shifts/masks are
    # applied once to the per-dw partials (they commute with the matmul).
    def partial_for(dwi):
        p = jnp.dot(wk_ref[0, dwi], bases[0], preferred_element_type=f32)
        p = p + jnp.dot(wk_ref[1, dwi], bases[1], preferred_element_type=f32)
        p = p + jnp.dot(wk_ref[2, dwi], bases[2], preferred_element_type=f32)
        return p

    p_w, p_c, p_e = partial_for(0), partial_for(1), partial_for(2)
    acc = p_c + beff
    acc = acc + jnp.where(col >= 1, lroll(p_w, 1), 0.0)
    acc = acc + jnp.where(col <= W - 2, lroll(p_e, -1), 0.0)

    if not has_halo:
        o_ref[0] = acc.astype(o_ref.dtype)
        return

    # Inter-strip halo rows: the row above the strip only touches output row 0
    # (frame lanes [0, W)); the row below only touches the last output row
    # (frame lanes [HW-W, HW)).  Both are 128-lane-aligned read-modify-writes
    # of the f32 accumulator.
    acc_ref[...] = acc
    HW = top_ref.shape[3]
    fr = lax.broadcasted_iota(jnp.int32, (1, HW), 1)

    top = top_ref[0, 0].astype(cd)             # (CinF, HW), cols at lanes [0, W)
    tw = jnp.dot(wk_ref[0, 0], top, preferred_element_type=f32)
    tc = jnp.dot(wk_ref[0, 1], top, preferred_element_type=f32)
    te = jnp.dot(wk_ref[0, 2], top, preferred_element_type=f32)
    corr_t = jnp.where(fr < W, tc, 0.0)
    corr_t = corr_t + jnp.where((fr >= 1) & (fr < W), lroll(tw, 1), 0.0)
    corr_t = corr_t + jnp.where(fr < W - 1, lroll(te, -1), 0.0)
    acc_ref[:, :HW] = acc_ref[:, :HW] + corr_t

    bot = bot_ref[0, 0].astype(cd)             # (CinF, HW), cols at lanes [HW-W, HW)
    bw = jnp.dot(wk_ref[2, 0], bot, preferred_element_type=f32)
    bc = jnp.dot(wk_ref[2, 1], bot, preferred_element_type=f32)
    be = jnp.dot(wk_ref[2, 2], bot, preferred_element_type=f32)
    cb = fr - (HW - W)
    corr_b = jnp.where(cb >= 0, bc, 0.0)
    corr_b = corr_b + jnp.where(cb >= 1, lroll(bw, 1), 0.0)
    corr_b = corr_b + jnp.where((cb >= 0) & (cb < W - 1), lroll(be, -1), 0.0)
    acc_ref[:, Ls - HW:] = acc_ref[:, Ls - HW:] + corr_b

    o_ref[0] = acc_ref[...].astype(o_ref.dtype)


def depthwise_separable_conv(x_nchw, wd, bd, wp, bp):
    """x: (N, Cin, H, W); wd: (Cin, 1, 3, 3); bd: (Cin,); wp: (Cout, Cin, 1, 1);
    bp: (Cout,).  Returns (N, Cout, H, W) in x's dtype (f32 or bf16 I/O)."""
    N, Cin, H, W = x_nchw.shape
    Cout = wp.shape[0]
    dtype = x_nchw.dtype
    itemsize = jnp.dtype(dtype).itemsize
    f32 = jnp.float32
    cd = jnp.bfloat16 if dtype == jnp.bfloat16 else f32    # MXU operand dtype

    vmem_cap = _vmem_capacity_bytes()
    Bn, Hs = _choose_tiling(N, H, W, Cin, Cout, itemsize, vmem_cap)
    NB, S = N // Bn, H // Hs
    Ls = Hs * W
    CinF, CoutF = Bn * Cin, Bn * Cout
    has_halo = S > 1
    HW = W if W % 128 == 0 else min(-(-W // 128) * 128, Ls)

    # ---- fused weights (tiny, wrapper-side) -------------------------------
    wd9 = wd.reshape(Cin, 9).astype(f32)                   # tap k = (dh+1)*3+(dw+1)
    wpm = wp.reshape(Cout, Cin).astype(f32)
    weff = wd9.T.reshape(3, 3, 1, Cin) * wpm.reshape(1, 1, Cout, Cin)
    if Bn > 1:   # block-diagonal expansion over the folded batch
        weff = jnp.einsum("ab,hwoc->hwaobc", jnp.eye(Bn, dtype=f32), weff)
        weff = weff.reshape(3, 3, CoutF, CinF)
    wk = weff.astype(cd)
    beff = jnp.tile(wpm @ bd.astype(f32) + bp.astype(f32), Bn).reshape(CoutF, 1)

    # ---- lane-dense, sublane-filled input view (free reshapes, no copies) --
    x_flat = x_nchw.reshape(NB, CinF, H * W)

    inputs = [x_flat]
    in_specs = [pl.BlockSpec((1, CinF, Ls), lambda n, s: (n, 0, s))]

    if has_halo:
        # 1-row halos per strip (tiny), pre-zeroed at the image border, padded
        # into a lane-aligned frame: top row at lanes [0, W), bottom row at
        # lanes [HW-W, HW), so the in-kernel fix-ups are aligned slices.
        zrow = jnp.zeros((N, Cin, 1, W), dtype)
        top = jnp.concatenate([zrow, x_nchw[:, :, Hs - 1:H - 1:Hs, :]], axis=2)
        bot = jnp.concatenate([x_nchw[:, :, Hs:H:Hs, :], zrow], axis=2)

        def fold_halo(h, left):
            h = jnp.transpose(h, (0, 2, 1, 3))             # (N, S, Cin, W)
            h = jnp.pad(h, ((0, 0), (0, 0), (0, 0), (left, HW - W - left)))
            h = h.reshape(NB, Bn, S, Cin, HW).transpose(0, 2, 1, 3, 4)
            return h.reshape(NB, S, CinF, HW)

        inputs += [fold_halo(top, 0), fold_halo(bot, HW - W)]
        in_specs += [pl.BlockSpec((1, 1, CinF, HW), lambda n, s: (n, s, 0, 0)),
                     pl.BlockSpec((1, 1, CinF, HW), lambda n, s: (n, s, 0, 0))]

    inputs += [wk, beff]
    in_specs += [pl.BlockSpec((3, 3, CoutF, CinF), lambda n, s: (0, 0, 0, 0)),
                 pl.BlockSpec((CoutF, 1), lambda n, s: (0, 0))]

    vmem_limit = max(32 << 20, min(vmem_cap * 3 // 4, vmem_cap - (16 << 20)))

    out_flat = pl.pallas_call(
        functools.partial(_dwsep_kernel, W=W, has_halo=has_halo),
        out_shape=jax.ShapeDtypeStruct((NB, CoutF, H * W), dtype),
        grid_spec=pltpu.PrefetchScalarGridSpec(
            num_scalar_prefetch=0,
            grid=(NB, S),
            in_specs=in_specs,
            out_specs=pl.BlockSpec((1, CoutF, Ls), lambda n, s: (n, 0, s)),
            scratch_shapes=[pltpu.VMEM((CoutF, Ls), jnp.float32)],
        ),
        compiler_params=pltpu.CompilerParams(
            dimension_semantics=("parallel", "parallel"),
            vmem_limit_bytes=int(vmem_limit),
        ),
    )(*inputs)
    return out_flat.reshape(N, Cout, H, W)


def _reference(x_nchw, wd, bd, wp, bp):
    """Pure-JAX reference using lax convs (mirrors torch Conv2d)."""
    Cin = x_nchw.shape[1]
    dw_out = lax.conv_general_dilated(
        x_nchw, wd, window_strides=(1, 1), padding=((1, 1), (1, 1)),
        feature_group_count=Cin,
        dimension_numbers=("NCHW", "OIHW", "NCHW"),
        precision=lax.Precision.HIGHEST)
    dw_out = dw_out + bd.reshape(1, -1, 1, 1)
    pw_out = lax.conv_general_dilated(
        dw_out, wp, window_strides=(1, 1), padding="VALID",
        dimension_numbers=("NCHW", "OIHW", "NCHW"),
        precision=lax.Precision.HIGHEST)
    return pw_out + bp.reshape(1, -1, 1, 1)


if __name__ == "__main__":
    N, Cin, Cout, H, W = 2, 4, 8, 16, 16

    key = jax.random.PRNGKey(0)
    kx, kwd, kbd, kwp, kbp = jax.random.split(key, 5)

    x = jax.random.normal(kx, (N, Cin, H, W), dtype=jnp.float32)
    wd = jax.random.normal(kwd, (Cin, 1, 3, 3), dtype=jnp.float32) * 0.2
    bd = jax.random.normal(kbd, (Cin,), dtype=jnp.float32) * 0.1
    wp = jax.random.normal(kwp, (Cout, Cin, 1, 1), dtype=jnp.float32) * 0.2
    bp = jax.random.normal(kbp, (Cout,), dtype=jnp.float32) * 0.1

    out = jax.block_until_ready(depthwise_separable_conv(x, wd, bd, wp, bp))
    ref = jax.block_until_ready(_reference(x, wd, bd, wp, bp))

    assert out.shape == (N, Cout, H, W), out.shape
    assert jnp.allclose(out, ref, atol=1e-3, rtol=1e-3), \
        float(jnp.max(jnp.abs(out - ref)))

    print("KERNEL_OK")
</pallas_src>

<mosaic_0001>
module attributes {stable_mosaic.version = 11 : i64} {
  func.func @_dwsep_kernel(%arg0: i32, %arg1: i32, %arg2: memref<1x8x128xf32, #tpu.memory_space<vmem>>, %arg3: memref<1x1x8x128xf32, #tpu.memory_space<vmem>>, %arg4: memref<1x1x8x128xf32, #tpu.memory_space<vmem>>, %arg5: memref<3x3x16x8xf32, #tpu.memory_space<vmem>>, %arg6: memref<16x1xf32, #tpu.memory_space<vmem>>, %arg7: memref<1x16x128xf32, #tpu.memory_space<vmem>>, %arg8: memref<16x128xf32, #tpu.memory_space<vmem>>) attributes {dimension_semantics = [#tpu.dimension_semantics<parallel>, #tpu.dimension_semantics<parallel>], iteration_bounds = array<i64: 1, 2>, scalar_prefetch = 0 : i64, scratch_operands = 1 : i64, tpu.core_type = #tpu.core_type<tc>, window_params = [{transform_indices = @transform_0, window_bounds = array<i64: 1, 8, 128>}, {transform_indices = @transform_1, window_bounds = array<i64: 1, 1, 8, 128>}, {transform_indices = @transform_2, window_bounds = array<i64: 1, 1, 8, 128>}, {pipeline_mode = #tpu.pipeline_mode<synchronous>, transform_indices = @transform_3, window_bounds = array<i64: 3, 3, 16, 8>}, {pipeline_mode = #tpu.pipeline_mode<synchronous>, transform_indices = @transform_4, window_bounds = array<i64: 16, 1>}, {transform_indices = @transform_5, window_bounds = array<i64: 1, 16, 128>}]} {
    %c0 = arith.constant 0 : index
    %c0_0 = arith.constant 0 : index
    %c0_1 = arith.constant 0 : index
    %0 = vector.load %arg2[%c0, %c0_0, %c0_1] : memref<1x8x128xf32, #tpu.memory_space<vmem>>, vector<1x8x128xf32>
    %1 = vector.shape_cast %0 : vector<1x8x128xf32> to vector<8x128xf32>
    %c0_2 = arith.constant 0 : index
    %c0_3 = arith.constant 0 : index
    %2 = vector.load %arg6[%c0_2, %c0_3] : memref<16x1xf32, #tpu.memory_space<vmem>>, vector<16x1xf32>
    %3 = tpu.iota {dimensions = array<i32: 1>} : vector<1x128xi32>
    %c16_i32 = arith.constant 16 : i32
    %c0_i32 = arith.constant 0 : i32
    %4 = arith.cmpi eq, %c16_i32, %c0_i32 : i32
    %c1_i32 = arith.constant 1 : i32
    %5 = arith.select %4, %c1_i32, %c16_i32 : i32
    %6 = vector.broadcast %5 : i32 to vector<1x128xi32>
    %7 = arith.remsi %3, %6 : vector<1x128xi32>
    %c0_i32_4 = arith.constant 0 : i32
    %8 = vector.broadcast %c0_i32_4 : i32 to vector<1x128xi32>
    %9 = arith.cmpi ne, %7, %8 : vector<1x128xi32>
    %c0_i32_5 = arith.constant 0 : i32
    %10 = vector.broadcast %c0_i32_5 : i32 to vector<1x128xi32>
    %11 = arith.cmpi slt, %7, %10 : vector<1x128xi32>
    %c0_i32_6 = arith.constant 0 : i32
    %12 = arith.cmpi slt, %5, %c0_i32_6 : i32
    %13 = vector.broadcast %12 : i1 to vector<1x128xi1>
    %14 = vector.broadcast %13 : vector<1x128xi1> to vector<1x128xi1>
    %15 = arith.xori %11, %14 : vector<1x128xi1>
    %16 = arith.andi %15, %9 : vector<1x128xi1>
    %17 = vector.broadcast %5 : i32 to vector<1x128xi32>
    %18 = arith.addi %7, %17 : vector<1x128xi32>
    %19 = arith.select %16, %18, %7 : vector<1x128xi1>, vector<1x128xi32>
    %c16_i32_7 = arith.constant 16 : i32
    %20 = vector.broadcast %c16_i32_7 : i32 to vector<1x128xi32>
    %21 = arith.cmpi sge, %3, %20 : vector<1x128xi32>
    %c16_i32_8 = arith.constant 16 : i32
    %22 = tpu.dynamic_rotate %1 by %c16_i32_8 dim 1 : vector<8x128xf32>, i32 -> vector<8x128xf32>
    %cst = arith.constant 0.000000e+00 : f32
    %23 = vector.shape_cast %21 : vector<1x128xi1> to vector<1x128xi1>
    %24 = vector.broadcast %23 : vector<1x128xi1> to vector<8x128xi1>
    %25 = vector.broadcast %cst : f32 to vector<8x128xf32>
    %26 = arith.select %24, %22, %25 : vector<8x128xi1>, vector<8x128xf32>
    %c112_i32 = arith.constant 112 : i32
    %27 = vector.broadcast %c112_i32 : i32 to vector<1x128xi32>
    %28 = arith.cmpi slt, %3, %27 : vector<1x128xi32>
    %c112_i32_9 = arith.constant 112 : i32
    %29 = tpu.dynamic_rotate %1 by %c112_i32_9 dim 1 : vector<8x128xf32>, i32 -> vector<8x128xf32>
    %cst_10 = arith.constant 0.000000e+00 : f32
    %30 = vector.shape_cast %28 : vector<1x128xi1> to vector<1x128xi1>
    %31 = vector.broadcast %30 : vector<1x128xi1> to vector<8x128xi1>
    %32 = vector.broadcast %cst_10 : f32 to vector<8x128xf32>
    %33 = arith.select %31, %29, %32 : vector<8x128xi1>, vector<8x128xf32>
    %c0_11 = arith.constant 0 : index
    %c0_12 = arith.constant 0 : index
    %c0_13 = arith.constant 0 : index
    %c0_14 = arith.constant 0 : index
    %34 = vector.load %arg5[%c0_11, %c0_12, %c0_13, %c0_14] : memref<3x3x16x8xf32, #tpu.memory_space<vmem>>, vector<1x1x16x8xf32>
    %35 = vector.shape_cast %34 : vector<1x1x16x8xf32> to vector<16x8xf32>
    %cst_15 = arith.constant dense<0.000000e+00> : vector<16x128xf32>
    %36 = tpu.matmul %35, %26, %cst_15 {dimension_numbers = #tpu.dot_dimension_numbers<[1], [0], [0], [1], [0, 0, 1, 1], [], []>} : vector<16x8xf32>, vector<8x128xf32>, vector<16x128xf32> -> vector<16x128xf32>
    %c1 = arith.constant 1 : index
    %c0_16 = arith.constant 0 : index
    %c0_17 = arith.constant 0 : index
    %c0_18 = arith.constant 0 : index
    %37 = vector.load %arg5[%c1, %c0_16, %c0_17, %c0_18] : memref<3x3x16x8xf32, #tpu.memory_space<vmem>>, vector<1x1x16x8xf32>
    %38 = vector.shape_cast %37 : vector<1x1x16x8xf32> to vector<16x8xf32>
    %cst_19 = arith.constant dense<0.000000e+00> : vector<16x128xf32>
    %39 = tpu.matmul %38, %1, %cst_19 {dimension_numbers = #tpu.dot_dimension_numbers<[1], [0], [0], [1], [0, 0, 1, 1], [], []>} : vector<16x8xf32>, vector<8x128xf32>, vector<16x128xf32> -> vector<16x128xf32>
    %40 = arith.addf %36, %39 : vector<16x128xf32>
    %c2 = arith.constant 2 : index
    %c0_20 = arith.constant 0 : index
    %c0_21 = arith.constant 0 : index
    %c0_22 = arith.constant 0 : index
    %41 = vector.load %arg5[%c2, %c0_20, %c0_21, %c0_22] : memref<3x3x16x8xf32, #tpu.memory_space<vmem>>, vector<1x1x16x8xf32>
    %42 = vector.shape_cast %41 : vector<1x1x16x8xf32> to vector<16x8xf32>
    %cst_23 = arith.constant dense<0.000000e+00> : vector<16x128xf32>
    %43 = tpu.matmul %42, %33, %cst_23 {dimension_numbers = #tpu.dot_dimension_numbers<[1], [0], [0], [1], [0, 0, 1, 1], [], []>} : vector<16x8xf32>, vector<8x128xf32>, vector<16x128xf32> -> vector<16x128xf32>
    %44 = arith.addf %40, %43 : vector<16x128xf32>
    %c0_24 = arith.constant 0 : index
    %c1_25 = arith.constant 1 : index
    %c0_26 = arith.constant 0 : index
    %c0_27 = arith.constant 0 : index
    %45 = vector.load %arg5[%c0_24, %c1_25, %c0_26, %c0_27] : memref<3x3x16x8xf32, #tpu.memory_space<vmem>>, vector<1x1x16x8xf32>
    %46 = vector.shape_cast %45 : vector<1x1x16x8xf32> to vector<16x8xf32>
    %cst_28 = arith.constant dense<0.000000e+00> : vector<16x128xf32>
    %47 = tpu.matmul %46, %26, %cst_28 {dimension_numbers = #tpu.dot_dimension_numbers<[1], [0], [0], [1], [0, 0, 1, 1], [], []>} : vector<16x8xf32>, vector<8x128xf32>, vector<16x128xf32> -> vector<16x128xf32>
    %c1_29 = arith.constant 1 : index
    %c1_30 = arith.constant 1 : index
    %c0_31 = arith.constant 0 : index
    %c0_32 = arith.constant 0 : index
    %48 = vector.load %arg5[%c1_29, %c1_30, %c0_31, %c0_32] : memref<3x3x16x8xf32, #tpu.memory_space<vmem>>, vector<1x1x16x8xf32>
    %49 = vector.shape_cast %48 : vector<1x1x16x8xf32> to vector<16x8xf32>
    %cst_33 = arith.constant dense<0.000000e+00> : vector<16x128xf32>
    %50 = tpu.matmul %49, %1, %cst_33 {dimension_numbers = #tpu.dot_dimension_numbers<[1], [0], [0], [1], [0, 0, 1, 1], [], []>} : vector<16x8xf32>, vector<8x128xf32>, vector<16x128xf32> -> vector<16x128xf32>
    %51 = arith.addf %47, %50 : vector<16x128xf32>
    %c2_34 = arith.constant 2 : index
    %c1_35 = arith.constant 1 : index
    %c0_36 = arith.constant 0 : index
    %c0_37 = arith.constant 0 : index
    %52 = vector.load %arg5[%c2_34, %c1_35, %c0_36, %c0_37] : memref<3x3x16x8xf32, #tpu.memory_space<vmem>>, vector<1x1x16x8xf32>
    %53 = vector.shape_cast %52 : vector<1x1x16x8xf32> to vector<16x8xf32>
    %cst_38 = arith.constant dense<0.000000e+00> : vector<16x128xf32>
    %54 = tpu.matmul %53, %33, %cst_38 {dimension_numbers = #tpu.dot_dimension_numbers<[1], [0], [0], [1], [0, 0, 1, 1], [], []>} : vector<16x8xf32>, vector<8x128xf32>, vector<16x128xf32> -> vector<16x128xf32>
    %55 = arith.addf %51, %54 : vector<16x128xf32>
    %c0_39 = arith.constant 0 : index
    %c2_40 = arith.constant 2 : index
    %c0_41 = arith.constant 0 : index
    %c0_42 = arith.constant 0 : index
    %56 = vector.load %arg5[%c0_39, %c2_40, %c0_41, %c0_42] : memref<3x3x16x8xf32, #tpu.memory_space<vmem>>, vector<1x1x16x8xf32>
    %57 = vector.shape_cast %56 : vector<1x1x16x8xf32> to vector<16x8xf32>
    %cst_43 = arith.constant dense<0.000000e+00> : vector<16x128xf32>
    %58 = tpu.matmul %57, %26, %cst_43 {dimension_numbers = #tpu.dot_dimension_numbers<[1], [0], [0], [1], [0, 0, 1, 1], [], []>} : vector<16x8xf32>, vector<8x128xf32>, vector<16x128xf32> -> vector<16x128xf32>
    %c1_44 = arith.constant 1 : index
    %c2_45 = arith.constant 2 : index
    %c0_46 = arith.constant 0 : index
    %c0_47 = arith.constant 0 : index
    %59 = vector.load %arg5[%c1_44, %c2_45, %c0_46, %c0_47] : memref<3x3x16x8xf32, #tpu.memory_space<vmem>>, vector<1x1x16x8xf32>
    %60 = vector.shape_cast %59 : vector<1x1x16x8xf32> to vector<16x8xf32>
    %cst_48 = arith.constant dense<0.000000e+00> : vector<16x128xf32>
    %61 = tpu.matmul %60, %1, %cst_48 {dimension_numbers = #tpu.dot_dimension_numbers<[1], [0], [0], [1], [0, 0, 1, 1], [], []>} : vector<16x8xf32>, vector<8x128xf32>, vector<16x128xf32> -> vector<16x128xf32>
    %62 = arith.addf %58, %61 : vector<16x128xf32>
    %c2_49 = arith.constant 2 : index
    %c2_50 = arith.constant 2 : index
    %c0_51 = arith.constant 0 : index
    %c0_52 = arith.constant 0 : index
    %63 = vector.load %arg5[%c2_49, %c2_50, %c0_51, %c0_52] : memref<3x3x16x8xf32, #tpu.memory_space<vmem>>, vector<1x1x16x8xf32>
    %64 = vector.shape_cast %63 : vector<1x1x16x8xf32> to vector<16x8xf32>
    %cst_53 = arith.constant dense<0.000000e+00> : vector<16x128xf32>
    %65 = tpu.matmul %64, %33, %cst_53 {dimension_numbers = #tpu.dot_dimension_numbers<[1], [0], [0], [1], [0, 0, 1, 1], [], []>} : vector<16x8xf32>, vector<8x128xf32>, vector<16x128xf32> -> vector<16x128xf32>
    %66 = arith.addf %62, %65 : vector<16x128xf32>
    %67 = vector.broadcast %2 : vector<16x1xf32> to vector<16x128xf32>
    %68 = arith.addf %55, %67 : vector<16x128xf32>
    %c1_i32_54 = arith.constant 1 : i32
    %69 = vector.broadcast %c1_i32_54 : i32 to vector<1x128xi32>
    %70 = arith.cmpi sge, %19, %69 : vector<1x128xi32>
    %c1_i32_55 = arith.constant 1 : i32
    %71 = tpu.dynamic_rotate %44 by %c1_i32_55 dim 1 : vector<16x128xf32>, i32 -> vector<16x128xf32>
    %cst_56 = arith.constant 0.000000e+00 : f32
    %72 = vector.shape_cast %70 : vector<1x128xi1> to vector<1x128xi1>
    %73 = vector.broadcast %72 : vector<1x128xi1> to vector<16x128xi1>
    %74 = vector.broadcast %cst_56 : f32 to vector<16x128xf32>
    %75 = arith.select %73, %71, %74 : vector<16x128xi1>, vector<16x128xf32>
    %76 = arith.addf %68, %75 : vector<16x128xf32>
    %c14_i32 = arith.constant 14 : i32
    %77 = vector.broadcast %c14_i32 : i32 to vector<1x128xi32>
    %78 = arith.cmpi sle, %19, %77 : vector<1x128xi32>
    %c127_i32 = arith.constant 127 : i32
    %79 = tpu.dynamic_rotate %66 by %c127_i32 dim 1 : vector<16x128xf32>, i32 -> vector<16x128xf32>
    %cst_57 = arith.constant 0.000000e+00 : f32
    %80 = vector.shape_cast %78 : vector<1x128xi1> to vector<1x128xi1>
    %81 = vector.broadcast %80 : vector<1x128xi1> to vector<16x128xi1>
    %82 = vector.broadcast %cst_57 : f32 to vector<16x128xf32>
    %83 = arith.select %81, %79, %82 : vector<16x128xi1>, vector<16x128xf32>
    %84 = arith.addf %76, %83 : vector<16x128xf32>
    %c0_58 = arith.constant 0 : index
    %c0_59 = arith.constant 0 : index
    %85 = vector.load %arg8[%c0_58, %c0_59] : memref<16x128xf32, #tpu.memory_space<vmem>>, vector<16x128xf32>
    tpu.vector_store %arg8[%c0_58, %c0_59], %84 {strides = array<i32>} : memref<16x128xf32, #tpu.memory_space<vmem>>, vector<16x128xf32>,
    %86 = tpu.iota {dimensions = array<i32: 1>} : vector<1x128xi32>
    %c0_60 = arith.constant 0 : index
    %c0_61 = arith.constant 0 : index
    %c0_62 = arith.constant 0 : index
    %c0_63 = arith.constant 0 : index
    %87 = vector.load %arg3[%c0_60, %c0_61, %c0_62, %c0_63] : memref<1x1x8x128xf32, #tpu.memory_space<vmem>>, vector<1x1x8x128xf32>
    %88 = vector.shape_cast %87 : vector<1x1x8x128xf32> to vector<8x128xf32>
    %c0_64 = arith.constant 0 : index
    %c0_65 = arith.constant 0 : index
    %c0_66 = arith.constant 0 : index
    %c0_67 = arith.constant 0 : index
    %89 = vector.load %arg5[%c0_64, %c0_65, %c0_66, %c0_67] : memref<3x3x16x8xf32, #tpu.memory_space<vmem>>, vector<1x1x16x8xf32>
    %90 = vector.shape_cast %89 : vector<1x1x16x8xf32> to vector<16x8xf32>
    %cst_68 = arith.constant dense<0.000000e+00> : vector<16x128xf32>
    %91 = tpu.matmul %90, %88, %cst_68 {dimension_numbers = #tpu.dot_dimension_numbers<[1], [0], [0], [1], [0, 0, 1, 1], [], []>} : vector<16x8xf32>, vector<8x128xf32>, vector<16x128xf32> -> vector<16x128xf32>
    %c0_69 = arith.constant 0 : index
    %c1_70 = arith.constant 1 : index
    %c0_71 = arith.constant 0 : index
    %c0_72 = arith.constant 0 : index
    %92 = vector.load %arg5[%c0_69, %c1_70, %c0_71, %c0_72] : memref<3x3x16x8xf32, #tpu.memory_space<vmem>>, vector<1x1x16x8xf32>
    %93 = vector.shape_cast %92 : vector<1x1x16x8xf32> to vector<16x8xf32>
    %cst_73 = arith.constant dense<0.000000e+00> : vector<16x128xf32>
    %94 = tpu.matmul %93, %88, %cst_73 {dimension_numbers = #tpu.dot_dimension_numbers<[1], [0], [0], [1], [0, 0, 1, 1], [], []>} : vector<16x8xf32>, vector<8x128xf32>, vector<16x128xf32> -> vector<16x128xf32>
    %c0_74 = arith.constant 0 : index
    %c2_75 = arith.constant 2 : index
    %c0_76 = arith.constant 0 : index
    %c0_77 = arith.constant 0 : index
    %95 = vector.load %arg5[%c0_74, %c2_75, %c0_76, %c0_77] : memref<3x3x16x8xf32, #tpu.memory_space<vmem>>, vector<1x1x16x8xf32>
    %96 = vector.shape_cast %95 : vector<1x1x16x8xf32> to vector<16x8xf32>
    %cst_78 = arith.constant dense<0.000000e+00> : vector<16x128xf32>
    %97 = tpu.matmul %96, %88, %cst_78 {dimension_numbers = #tpu.dot_dimension_numbers<[1], [0], [0], [1], [0, 0, 1, 1], [], []>} : vector<16x8xf32>, vector<8x128xf32>, vector<16x128xf32> -> vector<16x128xf32>
    %c16_i32_79 = arith.constant 16 : i32
    %98 = vector.broadcast %c16_i32_79 : i32 to vector<1x128xi32>
    %99 = arith.cmpi slt, %86, %98 : vector<1x128xi32>
    %cst_80 = arith.constant 0.000000e+00 : f32
    %100 = vector.shape_cast %99 : vector<1x128xi1> to vector<1x128xi1>
    %101 = vector.broadcast %100 : vector<1x128xi1> to vector<16x128xi1>
    %102 = vector.broadcast %cst_80 : f32 to vector<16x128xf32>
    %103 = arith.select %101, %94, %102 : vector<16x128xi1>, vector<16x128xf32>
    %c1_i32_81 = arith.constant 1 : i32
    %104 = vector.broadcast %c1_i32_81 : i32 to vector<1x128xi32>
    %105 = arith.cmpi sge, %86, %104 : vector<1x128xi32>
    %c16_i32_82 = arith.constant 16 : i32
    %106 = vector.broadcast %c16_i32_82 : i32 to vector<1x128xi32>
    %107 = arith.cmpi slt, %86, %106 : vector<1x128xi32>
    %108 = arith.andi %105, %107 : vector<1x128xi1>
    %c1_i32_83 = arith.constant 1 : i32
    %109 = tpu.dynamic_rotate %91 by %c1_i32_83 dim 1 : vector<16x128xf32>, i32 -> vector<16x128xf32>
    %cst_84 = arith.constant 0.000000e+00 : f32
    %110 = vector.shape_cast %108 : vector<1x128xi1> to vector<1x128xi1>
    %111 = vector.broadcast %110 : vector<1x128xi1> to vector<16x128xi1>
    %112 = vector.broadcast %cst_84 : f32 to vector<16x128xf32>
    %113 = arith.select %111, %109, %112 : vector<16x128xi1>, vector<16x128xf32>
    %114 = arith.addf %103, %113 : vector<16x128xf32>
    %c15_i32 = arith.constant 15 : i32
    %115 = vector.broadcast %c15_i32 : i32 to vector<1x128xi32>
    %116 = arith.cmpi slt, %86, %115 : vector<1x128xi32>
    %c127_i32_85 = arith.constant 127 : i32
    %117 = tpu.dynamic_rotate %97 by %c127_i32_85 dim 1 : vector<16x128xf32>, i32 -> vector<16x128xf32>
    %cst_86 = arith.constant 0.000000e+00 : f32
    %118 = vector.shape_cast %116 : vector<1x128xi1> to vector<1x128xi1>
    %119 = vector.broadcast %118 : vector<1x128xi1> to vector<16x128xi1>
    %120 = vector.broadcast %cst_86 : f32 to vector<16x128xf32>
    %121 = arith.select %119, %117, %120 : vector<16x128xi1>, vector<16x128xf32>
    %122 = arith.addf %114, %121 : vector<16x128xf32>
    %c0_87 = arith.constant 0 : index
    %c0_88 = arith.constant 0 : index
    %123 = vector.load %arg8[%c0_87, %c0_88] : memref<16x128xf32, #tpu.memory_space<vmem>>, vector<16x128xf32>
    %124 = arith.addf %123, %122 : vector<16x128xf32>
    %c0_89 = arith.constant 0 : index
    %c0_90 = arith.constant 0 : index
    %125 = vector.load %arg8[%c0_89, %c0_90] : memref<16x128xf32, #tpu.memory_space<vmem>>, vector<16x128xf32>
    tpu.vector_store %arg8[%c0_89, %c0_90], %124 {strides = array<i32>} : memref<16x128xf32, #tpu.memory_space<vmem>>, vector<16x128xf32>,
    %c0_91 = arith.constant 0 : index
    %c0_92 = arith.constant 0 : index
    %c0_93 = arith.constant 0 : index
    %c0_94 = arith.constant 0 : index
    %126 = vector.load %arg4[%c0_91, %c0_92, %c0_93, %c0_94] : memref<1x1x8x128xf32, #tpu.memory_space<vmem>>, vector<1x1x8x128xf32>
    %127 = vector.shape_cast %126 : vector<1x1x8x128xf32> to vector<8x128xf32>
    %c2_95 = arith.constant 2 : index
    %c0_96 = arith.constant 0 : index
    %c0_97 = arith.constant 0 : index
    %c0_98 = arith.constant 0 : index
    %128 = vector.load %arg5[%c2_95, %c0_96, %c0_97, %c0_98] : memref<3x3x16x8xf32, #tpu.memory_space<vmem>>, vector<1x1x16x8xf32>
    %129 = vector.shape_cast %128 : vector<1x1x16x8xf32> to vector<16x8xf32>
    %cst_99 = arith.constant dense<0.000000e+00> : vector<16x128xf32>
    %130 = tpu.matmul %129, %127, %cst_99 {dimension_numbers = #tpu.dot_dimension_numbers<[1], [0], [0], [1], [0, 0, 1, 1], [], []>} : vector<16x8xf32>, vector<8x128xf32>, vector<16x128xf32> -> vector<16x128xf32>
    %c2_100 = arith.constant 2 : index
    %c1_101 = arith.constant 1 : index
    %c0_102 = arith.constant 0 : index
    %c0_103 = arith.constant 0 : index
    %131 = vector.load %arg5[%c2_100, %c1_101, %c0_102, %c0_103] : memref<3x3x16x8xf32, #tpu.memory_space<vmem>>, vector<1x1x16x8xf32>
    %132 = vector.shape_cast %131 : vector<1x1x16x8xf32> to vector<16x8xf32>
    %cst_104 = arith.constant dense<0.000000e+00> : vector<16x128xf32>
    %133 = tpu.matmul %132, %127, %cst_104 {dimension_numbers = #tpu.dot_dimension_numbers<[1], [0], [0], [1], [0, 0, 1, 1], [], []>} : vector<16x8xf32>, vector<8x128xf32>, vector<16x128xf32> -> vector<16x128xf32>
    %c2_105 = arith.constant 2 : index
    %c2_106 = arith.constant 2 : index
    %c0_107 = arith.constant 0 : index
    %c0_108 = arith.constant 0 : index
    %134 = vector.load %arg5[%c2_105, %c2_106, %c0_107, %c0_108] : memref<3x3x16x8xf32, #tpu.memory_space<vmem>>, vector<1x1x16x8xf32>
    %135 = vector.shape_cast %134 : vector<1x1x16x8xf32> to vector<16x8xf32>
    %cst_109 = arith.constant dense<0.000000e+00> : vector<16x128xf32>
    %136 = tpu.matmul %135, %127, %cst_109 {dimension_numbers = #tpu.dot_dimension_numbers<[1], [0], [0], [1], [0, 0, 1, 1], [], []>} : vector<16x8xf32>, vector<8x128xf32>, vector<16x128xf32> -> vector<16x128xf32>
    %c112_i32_110 = arith.constant 112 : i32
    %137 = vector.broadcast %c112_i32_110 : i32 to vector<1x128xi32>
    %138 = arith.subi %86, %137 : vector<1x128xi32>
    %c0_i32_111 = arith.constant 0 : i32
    %139 = vector.broadcast %c0_i32_111 : i32 to vector<1x128xi32>
    %140 = arith.cmpi sge, %138, %139 : vector<1x128xi32>
    %cst_112 = arith.constant 0.000000e+00 : f32
    %141 = vector.shape_cast %140 : vector<1x128xi1> to vector<1x128xi1>
    %142 = vector.broadcast %141 : vector<1x128xi1> to vector<16x128xi1>
    %143 = vector.broadcast %cst_112 : f32 to vector<16x128xf32>
    %144 = arith.select %142, %133, %143 : vector<16x128xi1>, vector<16x128xf32>
    %c1_i32_113 = arith.constant 1 : i32
    %145 = vector.broadcast %c1_i32_113 : i32 to vector<1x128xi32>
    %146 = arith.cmpi sge, %138, %145 : vector<1x128xi32>
    %c1_i32_114 = arith.constant 1 : i32
    %147 = tpu.dynamic_rotate %130 by %c1_i32_114 dim 1 : vector<16x128xf32>, i32 -> vector<16x128xf32>
    %cst_115 = arith.constant 0.000000e+00 : f32
    %148 = vector.shape_cast %146 : vector<1x128xi1> to vector<1x128xi1>
    %149 = vector.broadcast %148 : vector<1x128xi1> to vector<16x128xi1>
    %150 = vector.broadcast %cst_115 : f32 to vector<16x128xf32>
    %151 = arith.select %149, %147, %150 : vector<16x128xi1>, vector<16x128xf32>
    %152 = arith.addf %144, %151 : vector<16x128xf32>
    %c0_i32_116 = arith.constant 0 : i32
    %153 = vector.broadcast %c0_i32_116 : i32 to vector<1x128xi32>
    %154 = arith.cmpi sge, %138, %153 : vector<1x128xi32>
    %c15_i32_117 = arith.constant 15 : i32
    %155 = vector.broadcast %c15_i32_117 : i32 to vector<1x128xi32>
    %156 = arith.cmpi slt, %138, %155 : vector<1x128xi32>
    %157 = arith.andi %154, %156 : vector<1x128xi1>
    %c127_i32_118 = arith.constant 127 : i32
    %158 = tpu.dynamic_rotate %136 by %c127_i32_118 dim 1 : vector<16x128xf32>, i32 -> vector<16x128xf32>
    %cst_119 = arith.constant 0.000000e+00 : f32
    %159 = vector.shape_cast %157 : vector<1x128xi1> to vector<1x128xi1>
    %160 = vector.broadcast %159 : vector<1x128xi1> to vector<16x128xi1>
    %161 = vector.broadcast %cst_119 : f32 to vector<16x128xf32>
    %162 = arith.select %160, %158, %161 : vector<16x128xi1>, vector<16x128xf32>
    %163 = arith.addf %152, %162 : vector<16x128xf32>
    %c0_120 = arith.constant 0 : index
    %c0_121 = arith.constant 0 : index
    %164 = vector.load %arg8[%c0_120, %c0_121] : memref<16x128xf32, #tpu.memory_space<vmem>>, vector<16x128xf32>
    %165 = arith.addf %164, %163 : vector<16x128xf32>
    %c0_122 = arith.constant 0 : index
    %c0_123 = arith.constant 0 : index
    %166 = vector.load %arg8[%c0_122, %c0_123] : memref<16x128xf32, #tpu.memory_space<vmem>>, vector<16x128xf32>
    tpu.vector_store %arg8[%c0_122, %c0_123], %165 {strides = array<i32>} : memref<16x128xf32, #tpu.memory_space<vmem>>, vector<16x128xf32>,
    %c0_124 = arith.constant 0 : index
    %c0_125 = arith.constant 0 : index
    %167 = vector.load %arg8[%c0_124, %c0_125] : memref<16x128xf32, #tpu.memory_space<vmem>>, vector<16x128xf32>
    %c0_126 = arith.constant 0 : index
    %c0_127 = arith.constant 0 : index
    %c0_128 = arith.constant 0 : index
    %168 = vector.load %arg7[%c0_126, %c0_127, %c0_128] : memref<1x16x128xf32, #tpu.memory_space<vmem>>, vector<1x16x128xf32>
    %169 = vector.shape_cast %168 : vector<1x16x128xf32> to vector<16x128xf32>
    %170 = vector.shape_cast %167 : vector<16x128xf32> to vector<1x16x128xf32>
    tpu.vector_store %arg7[%c0_126, %c0_127, %c0_128], %170 {strides = array<i32>} : memref<1x16x128xf32, #tpu.memory_space<vmem>>, vector<1x16x128xf32>,
    return
  }
  func.func @transform_0(%arg0: i32, %arg1: i32) -> (i32, i32, i32) {
    %c0_i32 = arith.constant 0 : i32
    %c0_i32_0 = arith.constant 0 : i32
    return %arg0, %c0_i32, %arg1 : i32, i32, i32
  }
  func.func @transform_1(%arg0: i32, %arg1: i32) -> (i32, i32, i32, i32) {
    %c0_i32 = arith.constant 0 : i32
    %c0_i32_0 = arith.constant 0 : i32
    %c0_i32_1 = arith.constant 0 : i32
    return %arg0, %arg1, %c0_i32, %c0_i32_0 : i32, i32, i32, i32
  }
  func.func @transform_2(%arg0: i32, %arg1: i32) -> (i32, i32, i32, i32) {
    %c0_i32 = arith.constant 0 : i32
    %c0_i32_0 = arith.constant 0 : i32
    %c0_i32_1 = arith.constant 0 : i32
    return %arg0, %arg1, %c0_i32, %c0_i32_0 : i32, i32, i32, i32
  }
  func.func @transform_3(%arg0: i32, %arg1: i32) -> (i32, i32, i32, i32) {
    %c0_i32 = arith.constant 0 : i32
    %c0_i32_0 = arith.constant 0 : i32
    %c0_i32_1 = arith.constant 0 : i32
    %c0_i32_2 = arith.constant 0 : i32
    %c0_i32_3 = arith.constant 0 : i32
    return %c0_i32, %c0_i32_0, %c0_i32_1, %c0_i32_2 : i32, i32, i32, i32
  }
  func.func @transform_4(%arg0: i32, %arg1: i32) -> (i32, i32) {
    %c0_i32 = arith.constant 0 : i32
    %c0_i32_0 = arith.constant 0 : i32
    %c0_i32_1 = arith.constant 0 : i32
    return %c0_i32, %c0_i32_0 : i32, i32
  }
  func.func @transform_5(%arg0: i32, %arg1: i32) -> (i32, i32, i32) {
    %c0_i32 = arith.constant 0 : i32
    %c0_i32_0 = arith.constant 0 : i32
    return %arg0, %c0_i32, %arg1 : i32, i32, i32
  }
}

</mosaic_0001>

<bundles_post_ra>
// kernel: tpu_custom_call.1
= control target key start
LH: loop header
LB: loop body
LE: loop exit
PB: predicated region body
PF: predicated region fallthrough
CT: control target
= control target key end

     0   :  { %10 = vsyncpa [#allocation4], 0  ;;  %s1594_s0 = inlined_call_operand.vmem [shape: f32[1,8,256], index: 0, kind: input, shape index: {}]   ;;  %s1595_s1 = inlined_call_operand.vmem [shape: f32[1,2,8,128], index: 1, kind: input, shape index: {}]   ;;  %s1596_s2 = inlined_call_operand.vmem [shape: f32[1,2,8,128], index: 2, kind: input, shape index: {}]   ;;  %s1597_s3 = inlined_call_operand.vmem [shape: f32[3,3,16,8], index: 3, kind: input, shape index: {}]   ;;  %s1598_s4 = inlined_call_operand.vmem [shape: f32[16,1], index: 4, kind: input, shape index: {}]   ;;  %s1599_s5 = inlined_call_operand.hbm [shape: f32[1,16,256], index: 5, kind: output, shape index: {}]  }
   0x1   :  { %12 = vsyncpa [#allocation4 + $0x1], 0  ;;  %s1321_s18 = smov 0   ;;  %s1323_s19 = smov 0  }
   0x2   :  { %s1325_s20 = smov 0   ;;  %s1327_s21 = smov 0  }
   0x3   :  { %s1329_s22 = smov 0   ;;  %s1331_s23 = smov 0  }
   0x4 LB: > { %s1061_s24 = sadd.s32 4294967295, %s1281_s23   ;;  %s1062_s25 = sadd.s32 4294967294, %s1281_s23   ;;  %s1281_s23 = sphi %s1331_s23, %s18_s23   ;;  %s1277_s22 = sphi %s1329_s22, %s1614_s22   ;;  %s1273_s21 = sphi %s1327_s21, %s1613_s21   ;;  %s1269_s20 = sphi %s1325_s20, %s1612_s20   ;;  %s1265_s19 = sphi %s1323_s19, %s1611_s19   ;;  %s1261_s18 = sphi %s1321_s18, %s1610_s18  }
   0x5   : > { %s27_s26 = sadd.s32 1, %s1277_s22  ;;  %s165_s27 = sadd.s32 1, %s1269_s20 }
   0x6   : > { %p28_p0 = scmp.ge.s32.totalorder %s27_s26, 2  ;;  %p175_p1 = scmp.ne.s32.totalorder %s1269_s20, %s1265_s19 }
   0x7   : > { %p176_p2 = scmp.eq.s32.totalorder %s1061_s24, 1  ;;  %p181_p3 = scmp.ne.s32.totalorder %s1265_s19, %s1261_s18 }
   0x8   : > { %s1616_s26 = smov (%p28_p0, %s27_s26), 0  ;;  %p182_p5 = scmp.eq.s32.totalorder %s1062_s25, 1 }
   0x9   : > { %p1361_p4 = por %p176_p2, %p175_p1  ;;  %s161_s29 = ssub.s32 %s1277_s22, %s1616_s26 }
   0xa   : > { %p1065_p6 = scmp.ge.s32.totalorder %s1281_s23, 1  ;;  %p163_p7 = scmp.eq.s32.totalorder %s161_s29, 0 }
   0xb   : > { %p1368_p8 = por %p182_p5, %p181_p3  ;;  %p239_p9 = scmp.lt.s32.totalorder %s1281_s23, 3 }
   0xc   : > { %s1374_s6 = scalar_select %p163_p7, %s1269_s20, %s165_s27  }
   0xd   : > { %p240_p10 = pnand %p1065_p6, %p239_p9 }
   0xe   : > { %p288_p11 = scmp.lt.s32.totalorder (!%p240_p10), %s1273_s21, 1  ;;  %s1283_s14 = smov (!%p240_p10), 112  }
   0xf   : > { %243 = sbr.rel (%p240_p10) target bundleno = 456 (0x1c8), region = 40  ;;  %s1284_s15 = smov (!%p240_p10), 16  }
  0x10   : > { %s1286_s16 = smov (!%p240_p10), 1   ;;  %s1287_s17 = smov (!%p240_p10), 127  }
  0x11   : > { %s283_s24 = sand.u32 (!%p240_p10), 1, %s1265_s19   ;;  %s1134_s29 = sshll.u32 (!%p240_p10), %s1273_s21, 3 }
  0x14   : > { %s289_s7 = scalar_select %p288_p11, %s1273_s21, 1  ;;  %v1071_v0 = vld [vmem:[%s1597_s3 + $0x38] sm:$0xff]  ;;  %vm344_vm0 = vcmask 64512   ;;  %v1070_v2 = vld [vmem:[%s1597_s3 + $0x30] sm:$0xff]  ;;  %v1084_v3 = vld [vmem:[%s1597_s3 + $0x40] sm:$0xff]  ;;  %v313_v5 = vlaneseq  ;;  %v1285_v11 = vmov 0  }
  0x15   : > { %v1085_v4 = vld [vmem:[%s1597_s3 + $0x48] sm:$0xff]  ;;  %v1077_v7 = vld [vmem:[%s1597_s3 + $0x60] sm:$0xff]  ;;  %1201 = vset.pattern.permute.xlu1 %v1285_v11  ;;  %1202 = vset.pattern.permute.xlu0 %v1285_v11  ;;  %v1082_v15 = vld [vmem:[%s1597_s3 + $0x10] sm:$0xff]  ;;  %s931_s21 = scalar_lea.sflag [#allocation4], %s283_s24 }
  0x16   : > { %s1378_s8 = sshll.u32 %s289_s7, 3  ;;  %v1400_v6 = vand.u32 127, %v313_v5  ;;  %v311_v10 = vld [vmem:[%s1598_s4] sm:$0xff]  ;;  %v1078_v14 = vld [vmem:[%s1597_s3 + $0x68] sm:$0xff]  ;;  %v1083_v20 = vld [vmem:[%s1597_s3 + $0x18] sm:$0xff] }
  0x17   : > { %s293_s11 = scalar_lea.vmem %s1594_s0, %s1378_s8  ;;  %s301_s10 = scalar_lea.vmem %s1595_s1, %s1378_s8  ;;  %635 = vperm.xlu1 %1201, %v311_v10   ;;  %v339_v12 = vld [vmem:[%s1597_s3] sm:$0xff]  ;;  %v312_v18 = vld [vmem:[%s1598_s4 + $0x8] sm:$0xff]  ;;  %v1098_v21 = vld [vmem:[%s1597_s3 + $0x50] sm:$0xff] }
  0x18   : > { %v310_v1 = vld [vmem:[%s293_s11] sm:$0xff]  ;;  %vm333_vm1 = vcmp.lt.s32.totalorder %v1400_v6, 112  ;;  %vm327_vm2 = vcmp.ge.s32.totalorder %v1400_v6, 16  ;;  %s309_s25 = scalar_lea.vmem %s1596_s2, %s1378_s8  ;;  %v340_v19 = vld [vmem:[%s1597_s3 + $0x8] sm:$0xff]  ;;  %v1091_v23 = vld [vmem:[%s1597_s3 + $0x70] sm:$0xff]  ;;  %v319_v10 = vand.u32 15, %v1400_v6 }
  0x19   : > { %334 = vrot.lane.b32.xlu0 %v310_v1, %s1283_s14  ;;  %1137 = vmatpush.msra.mxu3 %v310_v1  ;;  %v669_v9 = vld [vmem:[%s301_s10] sm:$0xff]  ;;  %v1097_v22 = vld [vmem:[%s1597_s3 + $0x28] sm:$0xff]  ;;  %v1099_v24 = vld [vmem:[%s1597_s3 + $0x58] sm:$0xff]  ;;  %vm768_vm3 = vcmp.ge.s32.totalorder %v1400_v6, 1  ;;  %vm763_vm5 = vcmp.lt.s32.totalorder %v1400_v6, 16  ;;  %vm780_vm7 = vcmp.lt.s32.totalorder %v1400_v6, 15  ;;  %s943_s10 = scalar_lea.hbm %s1599_s5, %s1134_s29 }
  0x1a   : > { %1073 = vmatmul.msk.f32.vlgmr.msra.gmra.mxu3 %vm344_vm0, %v1071_v0  ;;  %366 = vmatpush.msra.mxu0 %v310_v1  ;;  %v1096_v16 = vld [vmem:[%s1597_s3 + $0x20] sm:$0xff]  ;;  %v1092_v26 = vld [vmem:[%s1597_s3 + $0x78] sm:$0xff]  ;;  %v1106_v27 = vld [vmem:[%s1597_s3 + $0x88] sm:$0xff]  ;;  %vm1502_vm4 = vcmp.ge.s32.totalorder %v319_v10, 1  ;;  %vm1507_vm6 = vcmp.le.s32.totalorder %v319_v10, 14  ;;  %s946_s8 = sshll.u32 %s943_s10, 4  ;;  %s947_s8 = int_to_ptr.hbm [resolvable:$true] %s946_s8 }
  0x1b   : > { %464 = vmatpush.msrb.mxu3 %v310_v1  ;;  %1072 = vmatmul.msk.f32.vlgmr.msra.gmra.mxu0 %vm344_vm0, %v1070_v2  ;;  %v797_v17 = vld [vmem:[%s309_s25] sm:$0xff]  ;;  %vm1514_vm8 = vmand %vm768_vm3, %vm763_vm5  ;;  %s1066_s25 = sshll.u32 %s283_s24, 4  ;;  %s1217_s12 = sshra.s32 %s947_s8, 4  ;;  %s1218_s12 = int_to_ptr.hbm [resolvable:$true] %s1217_s12 }
  0x1c   : > { %v1105_v25 = vld [vmem:[%s1597_s3 + $0x80] sm:$0xff]  ;;  %s285_s27 = scalar_lea.vmem [#allocation3], %s1066_s25  ;;  %s1219_s13 = scalar_lea.hbm %s1218_s12, 16 }
  0x1d   : > { %s944_s11 = sshll.u32 %s285_s27, 4  ;;  %p1220_p12 = scmp.ne.s32.totalorder %s1218_s12, %s1219_s13  ;;  %s945_s11 = int_to_ptr.vmem [resolvable:$true] %s944_s11 }
  0x1e   : > { %p1224_p1 = scmp.lt.s32.totalorder %s1218_s12, %s1599_s5 }
  0x1f   : > { %640 = vperm.xlu1 %1201, %v312_v18   ;;  %p1221_p13 = pnand %p1220_p12, %p1361_p4 }
  0x21   : > { %328 = vrot.lane.b32.xlu0 %v310_v1, %s1284_s15  ;;  %p1222_p0 = pneg %p1221_p13 }
  0x22   : > { %1086 = vmatmul.msk.f32.vlgmr.msrb.gmra.mxu3 %vm344_vm0, %v1084_v3 }
  0x2a   : > { %1087 = vmatmul.msk.f32.gmra.mxu3 %vm344_vm0, %v1085_v4 }
  0x8b   : > { %v335_v8 = vpop.permute.xlu0 %334 }
  0x8c   : > { %1079 = vmatpush.msk.msra.mxu2 %vm333_vm1, %v335_v8 }
  0x8d   : > { %1080 = vmatmul.msk.f32.vlgmr.msra.gmra.mxu2 %vm344_vm0, %v1077_v7 }
  0x8e   : > { %562 = vmatpush.msrb.mxu2 %v310_v1 }
  0x90   : > { %724 = vmatpush.msra.mxu2 %v669_v9 }
  0x93   : > { %v329_v13 = vpop.permute.xlu0 %328 }
  0x94   : > { %1074 = vmatpush.msk.msra.mxu1 %vm327_vm2, %v329_v13  ;;  %1088 = vmatpush.msk.msrb.mxu0 %vm327_vm2, %v329_v13 }
  0x95   : > { %1102 = vmatpush.msk.msra.mxu3 %vm327_vm2, %v329_v13  ;;  %1075 = vmatmul.msk.f32.vlgmr.msra.gmra.mxu1 %vm344_vm0, %v339_v12 }
  0x96   : > { %1093 = vmatpush.msk.msrb.mxu1 %vm333_vm1, %v335_v8  ;;  %1107 = vmatpush.msk.msra.mxu0 %vm333_vm1, %v335_v8 }
  0x97   : > { %1081 = vmatmul.msk.f32.gmra.mxu2 %vm344_vm0, %v1078_v14  ;;  %1089 = vmatmul.msk.f32.vlgmr.msrb.gmra.mxu0 %vm344_vm0, %v1082_v15 }
  0x98   : > { %1103 = vmatmul.msk.f32.vlgmr.msra.gmra.mxu3 %vm344_vm0, %v1096_v16  ;;  %693 = vmatpush.msra.mxu1 %v669_v9  ;;  %v368_v30 = vpop.f32.mrf.mxu0 }
  0x99   : > { %755 = vmatpush.msrb.mxu3 %v669_v9  ;;  %821 = vmatpush.msrb.mxu0 %v797_v17 }
  0x9d   : > { %1076 = vmatmul.msk.f32.gmra.mxu1 %vm344_vm0, %v340_v19  ;;  %v371_v28 = vpop.f32.mrf.mxu3 }
  0x9f   : > { %1090 = vmatmul.msk.f32.gmra.mxu0 %vm344_vm0, %v1083_v20  ;;  %1100 = vmatmul.msk.f32.vlgmr.msrb.gmra.mxu2 %vm344_vm0, %v1098_v21  ;;  %v1132_v21 = vadd.s32 4294967184, %v1400_v6 }
  0xa0   : > { %1104 = vmatmul.msk.f32.gmra.mxu3 %vm344_vm0, %v1097_v22  ;;  %883 = vmatpush.msrb.mxu2 %v797_v17 }
  0xa1   : > { %vm892_vm9 = vcmp.ge.s32.totalorder %v1132_v21, 0  ;;  %vm908_vm10 = vcmp.lt.s32.totalorder %v1132_v21, 15  ;;  %vm897_vm11 = vcmp.ge.s32.totalorder %v1132_v21, 1 }
  0xa2   : > { %vm1532_vm12 = vmand %vm892_vm9, %vm908_vm10 }
  0xa5   : > { %1094 = vmatmul.msk.f32.vlgmr.msrb.gmra.mxu1 %vm344_vm0, %v1091_v23  ;;  %v466_v29 = vpop.f32.mrf.mxu3 }
  0xa6   : > { %852 = vmatpush.msrb.mxu1 %v797_v17 }
  0xa7   : > { %1101 = vmatmul.msk.f32.gmra.mxu2 %vm344_vm0, %v1099_v24  ;;  %1108 = vmatmul.msk.f32.vlgmr.msra.gmra.mxu0 %vm344_vm0, %v1105_v25 }
  0xa8   : > { %1118 = vmatmul.msk.f32.vlgmr.msrb.gmra.mxu3 %vm344_vm0, %v1096_v16 }
  0xad   : > { %1095 = vmatmul.msk.f32.gmra.mxu1 %vm344_vm0, %v1092_v26  ;;  %v469_v32 = vpop.f32.mrf.mxu3 }
  0xaf   : > { %1109 = vmatmul.msk.f32.gmra.mxu0 %vm344_vm0, %v1106_v27  ;;  %1114 = vmatmul.msk.f32.vlgmr.msra.gmra.mxu2 %vm344_vm0, %v1082_v15 }
  0xb0   : > { %1119 = vmatmul.msk.f32.gmra.mxu3 %vm344_vm0, %v1097_v22 }
  0xb5   : > { %1110 = vmatmul.msk.f32.vlgmr.msra.gmra.mxu1 %vm344_vm0, %v339_v12 }
  0xb7   : > { %1115 = vmatmul.msk.f32.gmra.mxu2 %vm344_vm0, %v1083_v20  ;;  %1122 = vmatmul.msk.f32.vlgmr.msrb.gmra.mxu0 %vm344_vm0, %v1077_v7  ;;  %v636_v7 = vpop.permute.xlu1 %635 }
  0xbd   : > { %1111 = vmatmul.msk.f32.gmra.mxu1 %vm344_vm0, %v340_v19 }
  0xbf   : > { %1130 = vmatmul.msk.f32.vlgmr.msrb.gmra.mxu2 %vm344_vm0, %v1105_v25  ;;  %1123 = vmatmul.msk.f32.gmra.mxu0 %vm344_vm0, %v1078_v14  ;;  %v641_v9 = vpop.permute.xlu1 %640 }
  0xc5   : > { %1126 = vmatmul.msk.f32.vlgmr.msrb.gmra.mxu1 %vm344_vm0, %v1091_v23 }
  0xc7   : > { %1131 = vmatmul.msk.f32.gmra.mxu2 %vm344_vm0, %v1106_v27 }
  0xcd   : > { %1127 = vmatmul.msk.f32.gmra.mxu1 %vm344_vm0, %v1092_v26 }
 0x110   : > { %v429_v31 = vpop.f32.mrf.mxu2 }
 0x112   : > { %v397_v33 = vpop.f32.mrf.mxu1 }
 0x113   : > { %v398_v34 = vadd.f32 %v397_v33, %v368_v30 }
 0x114   : > { %v495_v35 = vpop.f32.mrf.mxu0 }
 0x115   : > { %v435_v36 = vadd.f32 %v429_v31, %v398_v34  ;;  %v496_v37 = vadd.f32 %v495_v35, %v466_v29 }
 0x117   : > { %646 = vrot.lane.b32.xlu2 %v435_v36, %s1286_s16 }
 0x11a   : > { %v400_v38 = vpop.f32.mrf.mxu1  ;;  %v432_v39 = vpop.f32.mrf.mxu2 }
 0x11b   : > { %v401_v40 = vadd.f32 %v400_v38, %v371_v28  ;;  %v593_v41 = vpop.f32.mrf.mxu3 }
 0x11c   : > { %v498_v42 = vpop.f32.mrf.mxu0 }
 0x11d   : > { %v436_v43 = vadd.f32 %v432_v39, %v401_v40  ;;  %v499_v44 = vadd.f32 %v498_v42, %v469_v32 }
 0x11f   : > { %648 = vrot.lane.b32.xlu2 %v436_v43, %s1286_s16 }
 0x122   : > { %v527_v45 = vpop.f32.mrf.mxu1  ;;  %v564_v46 = vpop.f32.mrf.mxu2 }
 0x123   : > { %v533_v47 = vadd.f32 %v527_v45, %v496_v37  ;;  %v594_v48 = vadd.f32 %v593_v41, %v564_v46  ;;  %v596_v49 = vpop.f32.mrf.mxu3 }
 0x124   : > { %v625_v50 = vpop.f32.mrf.mxu0 }
 0x125   : > { %v631_v51 = vadd.f32 %v625_v50, %v594_v48  ;;  %v643_v17 = vadd.f32 %v636_v7, %v533_v47 }
 0x127   : > { %657 = vrot.lane.b32.xlu2 %v631_v51, %s1287_s17 }
 0x12a   : > { %v530_v52 = vpop.f32.mrf.mxu1  ;;  %v567_v53 = vpop.f32.mrf.mxu2 }
 0x12b   : > { %v1494_v54 = vadd.f32 %v530_v52, %v499_v44  ;;  %v757_v55 = vpop.f32.mrf.mxu3  ;;  %v597_v63 = vadd.f32 %v596_v49, %v567_v53 }
 0x12c   : > { %781 = vrot.lane.b32.xlu1 %v757_v55, %s1287_s17  ;;  %v628_v56 = vpop.f32.mrf.mxu0 }
 0x12d   : > { %v632_v0 = vadd.f32 %v628_v56, %v597_v63  ;;  %v644_v42 = vadd.f32 %v641_v9, %v1494_v54 }
 0x132   : > { %v695_v57 = vpop.f32.mrf.mxu1  ;;  %v726_v58 = vpop.f32.mrf.mxu2 }
 0x133   : > { %770 = vrot.lane.b32.xlu0 %v695_v57, %s1286_s16  ;;  %v760_v59 = vpop.f32.mrf.mxu3  ;;  %v766_v18 = vsel %vm763_vm5, %v726_v58, 0.0 }
 0x134   : > { %783 = vrot.lane.b32.xlu2 %v760_v59, %s1287_s17  ;;  %v823_v60 = vpop.f32.mrf.mxu0 }
 0x13a   : > { %v698_v61 = vpop.f32.mrf.mxu1  ;;  %v729_v62 = vpop.f32.mrf.mxu2 }
 0x13b   : > { %772 = vrot.lane.b32.xlu1 %v698_v61, %s1286_s16  ;;  %898 = vrot.lane.b32.xlu0 %v823_v60, %s1286_s16  ;;  %v767_v40 = vsel %vm763_vm5, %v729_v62, 0.0 }
 0x13c   : > { %v826_v1 = vpop.f32.mrf.mxu0 }
 0x142   : > { %v885_v2 = vpop.f32.mrf.mxu2  ;;  %v854_v28 = vpop.f32.mrf.mxu1 }
 0x143   : > { %659 = vrot.lane.b32.xlu0 %v632_v0, %s1287_s17  ;;  %910 = vrot.lane.b32.xlu2 %v885_v2, %s1287_s17  ;;  %v895_v31 = vsel %vm892_vm9, %v854_v28, 0.0 }
 0x144   : > { %900 = vrot.lane.b32.xlu1 %v826_v1, %s1286_s16  ;;  %s1223_s16 = scalar_lea.hbm %s1599_s5, 32 }
 0x145   : > { %p1225_p2 = scmp.lt.s32.totalorder %s1223_s16, %s1219_s13 }
 0x147   : > { %p1226_p3 = por %p1225_p2, %p1224_p1 }
 0x149   : > { %p1227_p5 = pnand %p1226_p3, %p1222_p0 }
 0x14a   : > { %v888_v3 = vpop.f32.mrf.mxu2  ;;  %v857_v48 = vpop.f32.mrf.mxu1 }
 0x14b   : > { %912 = vrot.lane.b32.xlu0 %v888_v3, %s1287_s17  ;;  %v896_v53 = vsel %vm892_vm9, %v857_v48, 0.0 }
 0x171   : > { %v647_v4 = vpop.permute.xlu2 %646 }
 0x172   : > { %v652_v16 = vsel %vm1502_vm4, %v647_v4, 0.0 }
 0x173   : > { %v654_v24 = vadd.f32 %v652_v16, %v643_v17 }
 0x179   : > { %v649_v5 = vpop.permute.xlu2 %648 }
 0x17a   : > { %v653_v41 = vsel %vm1502_vm4, %v649_v5, 0.0 }
 0x17b   : > { %v655_v46 = vadd.f32 %v653_v41, %v644_v42 }
 0x181   : > { %v658_v8 = vpop.permute.xlu2 %657 }
 0x182   : > { %v663_v20 = vsel %vm1507_vm6, %v658_v8, 0.0 }
 0x183   : > { %v665_v26 = vadd.f32 %v663_v20, %v654_v24 }
 0x18e   : > { %v784_v12 = vpop.permute.xlu2 %783 }
 0x18f   : > { %v788_v45 = vsel %vm780_vm7, %v784_v12, 0.0 }
 0x19d   : > { %v911_v30 = vpop.permute.xlu2 %910 }
 0x19e   : > { %v782_v15 = vpop.permute.xlu1 %781  ;;  %v916_v37 = vsel %vm1532_vm12, %v911_v30, 0.0 }
 0x19f   : > { %v787_v23 = vsel %vm780_vm7, %v782_v15, 0.0 }
 0x1a5   : > { %v771_v19 = vpop.permute.xlu0 %770 }
 0x1a6   : > { %v776_v22 = vsel %vm1514_vm8, %v771_v19, 0.0 }
 0x1a7   : > { %v778_v25 = vadd.f32 %v776_v22, %v766_v18 }
 0x1a9   : > { %v789_v27 = vadd.f32 %v787_v23, %v778_v25 }
 0x1ab   : > { %v793_v29 = vadd.f32 %v789_v27, %v665_v26 }
 0x1ad   : > { %v773_v33 = vpop.permute.xlu1 %772  ;;  %v899_v34 = vpop.permute.xlu0 %898 }
 0x1ae   : > { %v904_v35 = vsel %vm897_vm11, %v899_v34, 0.0  ;;  %v777_v38 = vsel %vm1514_vm8, %v773_v33, 0.0 }
 0x1af   : > { %v906_v36 = vadd.f32 %v904_v35, %v895_v31  ;;  %v779_v43 = vadd.f32 %v777_v38, %v767_v40 }
 0x1b1   : > { %v918_v39 = vadd.f32 %v916_v37, %v906_v36  ;;  %v790_v51 = vadd.f32 %v788_v45, %v779_v43 }
 0x1b3   : > { %v922_v44 = vadd.f32 %v918_v39, %v793_v29 }
 0x1b5   : > { %928 = vst [vmem:[%s285_s27] sm:$0xff] %v922_v44  ;;  %v660_v47 = vpop.permute.xlu0 %659 }
 0x1b6   : > { %v664_v49 = vsel %vm1507_vm6, %v660_v47, 0.0  ;;  %v901_v50 = vpop.permute.xlu1 %900 }
 0x1b7   : > { %v666_v52 = vadd.f32 %v664_v49, %v655_v46  ;;  %v905_v54 = vsel %vm897_vm11, %v901_v50, 0.0 }
 0x1b8   : > { %v907_v6 = vadd.f32 %v905_v54, %v896_v53 }
 0x1b9   : > { %v794_v55 = vadd.f32 %v790_v51, %v666_v52 }
 0x1bd   : > { %v913_v56 = vpop.permute.xlu0 %912 }
 0x1be   : > { %v917_v57 = vsel %vm1532_vm12, %v913_v56, 0.0 }
 0x1bf   : > { %v919_v58 = vadd.f32 %v917_v57, %v907_v6 }
 0x1c1   : > { %v923_v59 = vadd.f32 %v919_v58, %v794_v55 }
 0x1c3   : > { %929 = vst [vmem:[%s285_s27 + $0x8] sm:$0xff] %v923_v59 }
 0x1c4   : > { %1230 = shalt.err (!%p1227_p5)
}
 0x1c5   : > { %s1288_s24 = smov 128   ;;  %s1289_s27 = smov 256  }
 0x1c6   : > { %s1290_s29 = smov 8  }
 0x1c7   : > { %1138 = dma.vmem_to_hbm [thread:$0]  (%p1361_p4), %s945_s11, 256, %s947_s8, %s931_s21, %s1288_s24, %s1289_s27, %s1290_s29  }
 0x1c8 PF: > { %p1144_p6 = scmp.ge.s32.totalorder %s1281_s23, 2  ;;  %s961_s7 = sand.u32 1, %s1261_s18  }
 0x1c9   : > { %s962_s9 = scalar_lea.sflag [#allocation4], %s961_s7 }
 0x1ca   : > { %p1141_p7 = pnand %p1144_p6, %p1368_p8 }
 0x1cc   : > { %p1142_p9 = pneg %p1141_p7 }
 0x1ce   : > { %1256 = dma.done.wait (%p1142_p9), %s962_s9, 256  }
 0x1cf   : > { %1258 = vsyncadd (%p1142_p9), %s962_s9, 4294967040  ;;  %s18_s23 = sadd.s32 1, %s1281_s23   ;;  %s1610_s18 = smov %s1265_s19 }
 0x1d0   : > { %p15_p10 = scmp.ge.s32.totalorder %s18_s23, 4   ;;  %s1611_s19 = smov %s1269_s20 }
 0x1d1   : > { %s1612_s20 = smov %s1374_s6  ;;  %s1613_s21 = smov %s1277_s22 }
 0x1d2   : > { %s1614_s22 = smov %s1616_s26  ;;  %17 = sbr.rel (!%p15_p10) target bundleno = 4 (0x4), region = 89 }
 0x1d7   :  { %968 = vsyncpa [#allocation4], 1 }
 0x1d8   :  { %970 = vsyncpa [#allocation4 + $0x1], 1 }

</bundles_post_ra>
